<compile_context>
chip_gen: v6e
topology: v6e:2x2x1
jax: 0.10.0
libtpu: 0.0.40
codegen_flags: <defaults>
</compile_context>

<pallas_src>
import jax
import jax.numpy as jnp
from jax.experimental import pallas as pl
from jax.experimental.pallas import tpu as pltpu

COEFF_BCE = 20.0
_LANES = 128
_MAX_BLOCK_ROWS = 4096   # (4096, 128) f32 = 2 MiB per input block
_NCORES = 2              # per-core partial accumulators (2x on v7x, harmless on v5e/v6e)


def _partial_sums(score_2d, target_2d, total, rows, block_rows, n_blocks, n_inner):
    """Stream (rows, 128) score/target tiles and return (NCORES, 4, 128) f32
    lane-partials: row0=pos_count, row1=neg_count, row2=pos_bce, row3=neg_bce."""

    tail = total - (rows - 1) * _LANES                       # valid lanes in last row
    last_partial = (rows % block_rows != 0) or (tail != _LANES)
    has_phantom = (_NCORES * n_inner) != n_blocks

    def kernel(x_ref, t_ref, out_ref):
        c = pl.program_id(0)
        i = pl.program_id(1)

        @pl.when(i == 0)
        def _():
            out_ref[...] = jnp.zeros_like(out_ref)

        gb = c * n_inner + i      # global block index; >= n_blocks means phantom

        def accumulate(x, posf, negf):
            # Numerically-stable BCE with logits:
            #   max(x,0) - x*t + log(1 + exp(-|x|)).
            # Using posf for the x*t term is exact wherever the class-balance
            # weight is nonzero (pad / non-binary labels have zero weight).
            bce = jnp.maximum(x, 0.0) - x * posf + jnp.log(1.0 + jnp.exp(-jnp.abs(x)))
            # Direct fixed-row accumulation into the resident output block
            # (no per-step concatenate -> no XLU repack).
            out_ref[0, 0:1, :] += jnp.sum(posf, axis=0, keepdims=True)
            out_ref[0, 1:2, :] += jnp.sum(negf, axis=0, keepdims=True)
            out_ref[0, 2:3, :] += jnp.sum(posf * bce, axis=0, keepdims=True)
            out_ref[0, 3:4, :] += jnp.sum(negf * bce, axis=0, keepdims=True)

        def full_block():
            # Steady-state fast path: no iota, no mask, no where.
            x = x_ref[...].astype(jnp.float32)
            t = t_ref[...]
            accumulate(x, (t == 1).astype(jnp.float32), (t == 0).astype(jnp.float32))

        def masked_block():
            # Only the single last partial block pays for masking.
            row0 = gb * block_rows
            gr = row0 + jax.lax.broadcasted_iota(jnp.int32, (block_rows, _LANES), 0)
            if tail == _LANES:
                valid = gr < rows
            else:
                lane = jax.lax.broadcasted_iota(jnp.int32, (block_rows, _LANES), 1)
                valid = jnp.logical_or(
                    gr < rows - 1, jnp.logical_and(gr == rows - 1, lane < tail))
            # Zero invalid x so garbage/NaN pad never reaches exp/log.
            x = jnp.where(valid, x_ref[...].astype(jnp.float32), 0.0)
            t = t_ref[...]
            accumulate(
                x,
                jnp.logical_and(valid, t == 1).astype(jnp.float32),
                jnp.logical_and(valid, t == 0).astype(jnp.float32),
            )

        if last_partial:
            @pl.when(gb < n_blocks - 1)
            def _():
                full_block()

            @pl.when(gb == n_blocks - 1)
            def _():
                masked_block()
        elif has_phantom:
            @pl.when(gb < n_blocks)
            def _():
                full_block()
        else:
            full_block()

    def in_map(c, i):
        # Clamp phantom trailing blocks back in bounds; their contribution is
        # skipped entirely by the pl.when gating in the kernel.
        return (jnp.minimum(c * n_inner + i, n_blocks - 1), 0)

    return pl.pallas_call(
        kernel,
        out_shape=jax.ShapeDtypeStruct((_NCORES, 4, _LANES), jnp.float32),
        grid_spec=pltpu.PrefetchScalarGridSpec(
            num_scalar_prefetch=0,
            grid=(_NCORES, n_inner),
            in_specs=[
                pl.BlockSpec((block_rows, _LANES), in_map),
                pl.BlockSpec((block_rows, _LANES), in_map),
            ],
            out_specs=pl.BlockSpec((1, 4, _LANES), lambda c, i: (c, 0, 0)),
        ),
        compiler_params=pltpu.CompilerParams(
            dimension_semantics=("parallel", "arbitrary"),
        ),
    )(score_2d, target_2d)


def boundary_loss(score, target, coeff_bce=COEFF_BCE):
    """JAX/Pallas equivalent of BoundaryLoss.forward.

    score:  (N, C, H, W) float logits (NCHW, like PyTorch).
    target: any shape with N*C*H*W elements, values in {0, 1} (others are
            zero-weighted, matching the PyTorch module).
    """
    n, c, h, w = score.shape
    m = n * c * h * w

    # score.permute(0,2,3,1).view(1,-1) is an identity reordering when C == 1
    # (standard PIDNet boundary head) -> skip the HBM-copying transpose.
    if c == 1:
        score_flat = score.reshape(-1)
    else:
        score_flat = jnp.transpose(score, (0, 2, 3, 1)).reshape(-1)

    target_flat = target.reshape(-1)
    if target_flat.dtype == jnp.bool_:
        # Prefer passing int8/float targets from the caller to avoid this pass.
        target_flat = target_flat.astype(jnp.int8)

    total = m
    rows = pl.cdiv(total, _LANES)
    padded = rows * _LANES
    if padded != total:
        # Rare fallback: pad only to the next lane multiple (<128 elems).  The
        # padded tail is masked in-kernel, so the pad value is irrelevant.
        score_flat = jnp.pad(score_flat, (0, padded - total))
        target_flat = jnp.pad(target_flat, (0, padded - total))

    score_2d = score_flat.reshape(rows, _LANES)
    target_2d = target_flat.reshape(rows, _LANES)

    block_rows = min(_MAX_BLOCK_ROWS, rows)   # full-dim block if rows is small
    n_blocks = pl.cdiv(rows, block_rows)
    n_inner = pl.cdiv(n_blocks, _NCORES)

    partials = _partial_sums(score_2d, target_2d, total, rows,
                             block_rows, n_blocks, n_inner)
    sums = jnp.sum(partials, axis=(0, 2))     # (4,)
    pos_num, neg_num = sums[0], sums[1]
    pos_bce_sum, neg_bce_sum = sums[2], sums[3]

    # NOTE: sum_num == 0 (no 0/1 labels at all) yields NaN, matching PyTorch.
    sum_num = pos_num + neg_num
    weighted_sum = (neg_num / sum_num) * pos_bce_sum + (pos_num / sum_num) * neg_bce_sum
    return coeff_bce * weighted_sum / jnp.float32(m)


def _reference_boundary_loss(score, target, coeff_bce=COEFF_BCE):
    """Pure-JAX reference mirroring the PyTorch module (for verification)."""
    score_f = jnp.transpose(score, (0, 2, 3, 1)).reshape(1, -1).astype(jnp.float32)
    target_f = target.reshape(1, -1).astype(jnp.float32)
    pos = target_f == 1.0
    neg = target_f == 0.0
    pos_num = jnp.sum(pos)
    neg_num = jnp.sum(neg)
    sum_num = pos_num + neg_num
    weight = jnp.where(pos, neg_num / sum_num, 0.0)
    weight = jnp.where(neg, pos_num / sum_num, weight)
    x, t = score_f, target_f
    bce = jnp.maximum(x, 0.0) - x * t + jnp.log(1.0 + jnp.exp(-jnp.abs(x)))
    return coeff_bce * jnp.mean(weight * bce)


if __name__ == "__main__":
    key = jax.random.PRNGKey(0)
    k1, k2, k3, k4 = jax.random.split(key, 4)

    # Case 1: standard PIDNet boundary head (C == 1, transpose skipped).
    N, C, H, W = 2, 1, 16, 16
    score1 = jax.random.normal(k1, (N, C, H, W), dtype=jnp.float32)
    target1 = (jax.random.uniform(k2, (N, H, W)) > 0.7).astype(jnp.float32)
    loss1 = jax.block_until_ready(boundary_loss(score1, target1))
    ref1 = _reference_boundary_loss(score1, target1)
    assert jnp.allclose(loss1, ref1, rtol=1e-5, atol=1e-5), (loss1, ref1)

    # Case 2: C > 1 path (exercises the NHWC permute pairing).
    N, C, H, W = 2, 4, 16, 16
    score2 = jax.random.normal(k3, (N, C, H, W), dtype=jnp.float32)
    target2 = (jax.random.uniform(k4, (N, H, W, C)) > 0.6).astype(jnp.float32)
    loss2 = jax.block_until_ready(boundary_loss(score2, target2))
    ref2 = _reference_boundary_loss(score2, target2)
    assert jnp.allclose(loss2, ref2, rtol=1e-5, atol=1e-5), (loss2, ref2)

    print("KERNEL_OK")
</pallas_src>

<mosaic_0001>
module attributes {stable_mosaic.version = 11 : i64} {
  func.func @kernel(%arg0: i32, %arg1: i32, %arg2: memref<4x128xf32, #tpu.memory_space<vmem>>, %arg3: memref<4x128xf32, #tpu.memory_space<vmem>>, %arg4: memref<1x4x128xf32, #tpu.memory_space<vmem>>) attributes {dimension_semantics = [#tpu.dimension_semantics<parallel>, #tpu.dimension_semantics<arbitrary>], iteration_bounds = array<i64: 2, 1>, scalar_prefetch = 0 : i64, scratch_operands = 0 : i64, tpu.core_type = #tpu.core_type<tc>, window_params = [{transform_indices = @transform_0, window_bounds = array<i64: 4, 128>}, {transform_indices = @transform_1, window_bounds = array<i64: 4, 128>}, {transform_indices = @transform_2, window_bounds = array<i64: 1, 4, 128>}]} {
    %c0_i32 = arith.constant 0 : i32
    %0 = arith.cmpi eq, %arg1, %c0_i32 : i32
    %1 = arith.extui %0 : i1 to i32
    %c0_i32_0 = arith.constant 0 : i32
    %2 = arith.cmpi ne, %1, %c0_i32_0 : i32
    scf.if %2 {
      %cst = arith.constant 0.000000e+00 : f32
      %8 = vector.broadcast %cst : f32 to vector<1x4x128xf32>
      %c0 = arith.constant 0 : index
      %c0_3 = arith.constant 0 : index
      %c0_4 = arith.constant 0 : index
      %9 = vector.load %arg4[%c0, %c0_3, %c0_4] : memref<1x4x128xf32, #tpu.memory_space<vmem>>, vector<1x4x128xf32>
      tpu.vector_store %arg4[%c0, %c0_3, %c0_4], %8 {strides = array<i32>} : memref<1x4x128xf32, #tpu.memory_space<vmem>>, vector<1x4x128xf32>,
    } else {
    }
    %c1_i32 = arith.constant 1 : i32
    %3 = arith.muli %arg0, %c1_i32 : i32
    %4 = arith.addi %3, %arg1 : i32
    %c1_i32_1 = arith.constant 1 : i32
    %5 = arith.cmpi slt, %4, %c1_i32_1 : i32
    %6 = arith.extui %5 : i1 to i32
    %c0_i32_2 = arith.constant 0 : i32
    %7 = arith.cmpi ne, %6, %c0_i32_2 : i32
    scf.if %7 {
      %c0 = arith.constant 0 : index
      %c0_3 = arith.constant 0 : index
      %8 = vector.load %arg2[%c0, %c0_3] : memref<4x128xf32, #tpu.memory_space<vmem>>, vector<4x128xf32>
      %c0_4 = arith.constant 0 : index
      %c0_5 = arith.constant 0 : index
      %9 = vector.load %arg3[%c0_4, %c0_5] : memref<4x128xf32, #tpu.memory_space<vmem>>, vector<4x128xf32>
      %cst = arith.constant 1.000000e+00 : f32
      %10 = vector.broadcast %cst : f32 to vector<4x128xf32>
      %11 = arith.cmpf oeq, %9, %10 : vector<4x128xf32>
      %12 = arith.extui %11 : vector<4x128xi1> to vector<4x128xi32>
      %13 = arith.sitofp %12 : vector<4x128xi32> to vector<4x128xf32>
      %cst_6 = arith.constant 0.000000e+00 : f32
      %14 = vector.broadcast %cst_6 : f32 to vector<4x128xf32>
      %15 = arith.cmpf oeq, %9, %14 : vector<4x128xf32>
      %16 = arith.extui %15 : vector<4x128xi1> to vector<4x128xi32>
      %17 = arith.sitofp %16 : vector<4x128xi32> to vector<4x128xf32>
      %cst_7 = arith.constant 0.000000e+00 : f32
      %18 = vector.broadcast %cst_7 : f32 to vector<4x128xf32>
      %19 = arith.maximumf %8, %18 : vector<4x128xf32>
      %20 = arith.mulf %8, %13 : vector<4x128xf32>
      %21 = arith.subf %19, %20 : vector<4x128xf32>
      %22 = math.absf %8 : vector<4x128xf32>
      %cst_8 = arith.constant 0.000000e+00 : f32
      %23 = vector.broadcast %cst_8 : f32 to vector<4x128xf32>
      %24 = arith.subf %23, %22 : vector<4x128xf32>
      %25 = math.exp %24 : vector<4x128xf32>
      %cst_9 = arith.constant 1.000000e+00 : f32
      %26 = vector.broadcast %cst_9 : f32 to vector<4x128xf32>
      %27 = arith.addf %26, %25 : vector<4x128xf32>
      %28 = math.log %27 : vector<4x128xf32>
      %29 = arith.addf %21, %28 : vector<4x128xf32>
      %c0_10 = arith.constant 0 : index
      %c0_11 = arith.constant 0 : index
      %c0_12 = arith.constant 0 : index
      %30 = vector.load %arg4[%c0_10, %c0_11, %c0_12] : memref<1x4x128xf32, #tpu.memory_space<vmem>>, vector<1x1x128xf32>
      %31 = vector.shape_cast %30 : vector<1x1x128xf32> to vector<1x128xf32>
      %cst_13 = arith.constant dense<0.000000e+00> : vector<128xf32>
      %32 = vector.multi_reduction <add>, %13, %cst_13 [0] : vector<4x128xf32> to vector<128xf32>
      %33 = vector.shape_cast %32 : vector<128xf32> to vector<1x128xf32>
      %34 = arith.addf %31, %33 : vector<1x128xf32>
      %c0_14 = arith.constant 0 : index
      %c0_15 = arith.constant 0 : index
      %c0_16 = arith.constant 0 : index
      %35 = vector.load %arg4[%c0_14, %c0_15, %c0_16] : memref<1x4x128xf32, #tpu.memory_space<vmem>>, vector<1x1x128xf32>
      %36 = vector.shape_cast %35 : vector<1x1x128xf32> to vector<1x128xf32>
      %37 = vector.shape_cast %34 : vector<1x128xf32> to vector<1x1x128xf32>
      tpu.vector_store %arg4[%c0_14, %c0_15, %c0_16], %37 {strides = array<i32>} : memref<1x4x128xf32, #tpu.memory_space<vmem>>, vector<1x1x128xf32>,
      %c0_17 = arith.constant 0 : index
      %c1 = arith.constant 1 : index
      %c0_18 = arith.constant 0 : index
      %38 = vector.load %arg4[%c0_17, %c1, %c0_18] : memref<1x4x128xf32, #tpu.memory_space<vmem>>, vector<1x1x128xf32>
      %39 = vector.shape_cast %38 : vector<1x1x128xf32> to vector<1x128xf32>
      %cst_19 = arith.constant dense<0.000000e+00> : vector<128xf32>
      %40 = vector.multi_reduction <add>, %17, %cst_19 [0] : vector<4x128xf32> to vector<128xf32>
      %41 = vector.shape_cast %40 : vector<128xf32> to vector<1x128xf32>
      %42 = arith.addf %39, %41 : vector<1x128xf32>
      %c0_20 = arith.constant 0 : index
      %c1_21 = arith.constant 1 : index
      %c0_22 = arith.constant 0 : index
      %43 = vector.load %arg4[%c0_20, %c1_21, %c0_22] : memref<1x4x128xf32, #tpu.memory_space<vmem>>, vector<1x1x128xf32>
      %44 = vector.shape_cast %43 : vector<1x1x128xf32> to vector<1x128xf32>
      %45 = vector.shape_cast %42 : vector<1x128xf32> to vector<1x1x128xf32>
      tpu.vector_store %arg4[%c0_20, %c1_21, %c0_22], %45 {strides = array<i32>} : memref<1x4x128xf32, #tpu.memory_space<vmem>>, vector<1x1x128xf32>,
      %c0_23 = arith.constant 0 : index
      %c2 = arith.constant 2 : index
      %c0_24 = arith.constant 0 : index
      %46 = vector.load %arg4[%c0_23, %c2, %c0_24] : memref<1x4x128xf32, #tpu.memory_space<vmem>>, vector<1x1x128xf32>
      %47 = vector.shape_cast %46 : vector<1x1x128xf32> to vector<1x128xf32>
      %48 = arith.mulf %13, %29 : vector<4x128xf32>
      %cst_25 = arith.constant dense<0.000000e+00> : vector<128xf32>
      %49 = vector.multi_reduction <add>, %48, %cst_25 [0] : vector<4x128xf32> to vector<128xf32>
      %50 = vector.shape_cast %49 : vector<128xf32> to vector<1x128xf32>
      %51 = arith.addf %47, %50 : vector<1x128xf32>
      %c0_26 = arith.constant 0 : index
      %c2_27 = arith.constant 2 : index
      %c0_28 = arith.constant 0 : index
      %52 = vector.load %arg4[%c0_26, %c2_27, %c0_28] : memref<1x4x128xf32, #tpu.memory_space<vmem>>, vector<1x1x128xf32>
      %53 = vector.shape_cast %52 : vector<1x1x128xf32> to vector<1x128xf32>
      %54 = vector.shape_cast %51 : vector<1x128xf32> to vector<1x1x128xf32>
      tpu.vector_store %arg4[%c0_26, %c2_27, %c0_28], %54 {strides = array<i32>} : memref<1x4x128xf32, #tpu.memory_space<vmem>>, vector<1x1x128xf32>,
      %c0_29 = arith.constant 0 : index
      %c3 = arith.constant 3 : index
      %c0_30 = arith.constant 0 : index
      %55 = vector.load %arg4[%c0_29, %c3, %c0_30] : memref<1x4x128xf32, #tpu.memory_space<vmem>>, vector<1x1x128xf32>
      %56 = vector.shape_cast %55 : vector<1x1x128xf32> to vector<1x128xf32>
      %57 = arith.mulf %17, %29 : vector<4x128xf32>
      %cst_31 = arith.constant dense<0.000000e+00> : vector<128xf32>
      %58 = vector.multi_reduction <add>, %57, %cst_31 [0] : vector<4x128xf32> to vector<128xf32>
      %59 = vector.shape_cast %58 : vector<128xf32> to vector<1x128xf32>
      %60 = arith.addf %56, %59 : vector<1x128xf32>
      %c0_32 = arith.constant 0 : index
      %c3_33 = arith.constant 3 : index
      %c0_34 = arith.constant 0 : index
      %61 = vector.load %arg4[%c0_32, %c3_33, %c0_34] : memref<1x4x128xf32, #tpu.memory_space<vmem>>, vector<1x1x128xf32>
      %62 = vector.shape_cast %61 : vector<1x1x128xf32> to vector<1x128xf32>
      %63 = vector.shape_cast %60 : vector<1x128xf32> to vector<1x1x128xf32>
      tpu.vector_store %arg4[%c0_32, %c3_33, %c0_34], %63 {strides = array<i32>} : memref<1x4x128xf32, #tpu.memory_space<vmem>>, vector<1x1x128xf32>,
    } else {
    }
    return
  }
  func.func @transform_0(%arg0: i32, %arg1: i32) -> (i32, i32) {
    %c1_i32 = arith.constant 1 : i32
    %0 = arith.muli %arg0, %c1_i32 : i32
    %1 = arith.addi %0, %arg1 : i32
    %c0_i32 = arith.constant 0 : i32
    %2 = arith.minsi %1, %c0_i32 : i32
    %c0_i32_0 = arith.constant 0 : i32
    %c0_i32_1 = arith.constant 0 : i32
    return %2, %c0_i32_0 : i32, i32
  }
  func.func @transform_1(%arg0: i32, %arg1: i32) -> (i32, i32) {
    %c1_i32 = arith.constant 1 : i32
    %0 = arith.muli %arg0, %c1_i32 : i32
    %1 = arith.addi %0, %arg1 : i32
    %c0_i32 = arith.constant 0 : i32
    %2 = arith.minsi %1, %c0_i32 : i32
    %c0_i32_0 = arith.constant 0 : i32
    %c0_i32_1 = arith.constant 0 : i32
    return %2, %c0_i32_0 : i32, i32
  }
  func.func @transform_2(%arg0: i32, %arg1: i32) -> (i32, i32, i32) {
    %c0_i32 = arith.constant 0 : i32
    %c0_i32_0 = arith.constant 0 : i32
    %c0_i32_1 = arith.constant 0 : i32
    return %arg0, %c0_i32, %c0_i32_0 : i32, i32, i32
  }
}

</mosaic_0001>

<bundles_post_ra>
// kernel: tpu_custom_call.1
= control target key start
LH: loop header
LB: loop body
LE: loop exit
PB: predicated region body
PF: predicated region fallthrough
CT: control target
= control target key end

     0   :  { %7 = vsyncpa [#allocation3], 0  ;;  %s921_s0 = inlined_call_operand.hbm [shape: f32[4,128], index: 0, kind: input, shape index: {}]   ;;  %s922_s1 = inlined_call_operand.hbm [shape: f32[4,128], index: 1, kind: input, shape index: {}]   ;;  %s923_s2 = inlined_call_operand.hbm [shape: f32[2,4,128], index: 2, kind: output, shape index: {}]  }
   0x1   :  { %9 = vsyncpa [#allocation3 + $0x1], 0 }
   0x2   :  { %10 = vsyncpa [#allocation6], 0 }
   0x3   :  { %12 = vsyncpa [#allocation6 + $0x1], 0 }
   0x4   :  { %13 = vsyncpa [#allocation4], 0 }
   0x5   :  { %15 = vsyncpa [#allocation4 + $0x1], 0  ;;  %s718_s9 = smov 0   ;;  %s720_s10 = smov 0  }
   0x6   :  { %s722_s11 = smov 0   ;;  %s724_s12 = smov 0  }
   0x7   :  { %s726_s13 = smov 0   ;;  %s728_s14 = smov 0  }
   0x8   :  { %s730_s15 = smov 0   ;;  %s732_s16 = smov 0  }
   0x9 LB: > { %s419_s17 = sadd.s32 4294967295, %s696_s16   ;;  %s420_s18 = sadd.s32 4294967294, %s696_s16   ;;  %s696_s16 = sphi %s732_s16, %s21_s16   ;;  %s692_s15 = sphi %s730_s15, %s944_s15   ;;  %s688_s14 = sphi %s728_s14, %s943_s14   ;;  %s684_s13 = sphi %s726_s13, %s911_s13   ;;  %s680_s12 = sphi %s724_s12, %s942_s12   ;;  %s676_s11 = sphi %s722_s11, %s941_s11   ;;  %s672_s10 = sphi %s720_s10, %s940_s10   ;;  %s668_s9 = sphi %s718_s9, %s939_s9  }
   0xa   : > { %s33_s19 = sadd.s32 1, %s692_s15  ;;  %p665_p1 = scmp.ne.s32.totalorder %s684_s13, 0 }
   0xb   : > { %p35_p0 = scmp.ge.s32.totalorder %s33_s19, 2  ;;  %p54_p2 = scmp.eq.s32.totalorder %s696_s16, 0 }
   0xc   : > { %p59_p3 = scmp.ne.s32.totalorder %s684_s13, %s680_s12  ;;  %p60_p5 = scmp.eq.s32.totalorder %s419_s17, 0 }
   0xd   : > { %s946_s19 = smov (%p35_p0, %s33_s19), 0  ;;  %p764_p4 = por %p665_p1, %p54_p2 }
   0xe   : > { %p768_p6 = por %p60_p5, %p59_p3  ;;  %s101_s22 = ssub.s32 %s692_s15, %s946_s19 }
   0xf   : > { %p102_p7 = scmp.eq.s32.totalorder %s101_s22, 0  ;;  %s104_s23 = sadd.s32 1, %s676_s11 }
  0x10   : > { %s927_s21 = scalar_select %p768_p6, 1, 0 }
  0x11   : > { %s776_s24 = scalar_select %p102_p7, %s676_s11, %s104_s23  }
  0x12   : > { %p114_p8 = scmp.ne.s32.totalorder %s676_s11, %s672_s10  ;;  %p115_p9 = scmp.eq.s32.totalorder %s419_s17, 1 }
  0x13   : > { %p120_p10 = scmp.ne.s32.totalorder %s672_s10, %s668_s9  ;;  %p121_p11 = scmp.eq.s32.totalorder %s420_s18, 1 }
  0x14   : > { %p782_p12 = por %p115_p9, %p114_p8  ;;  %p455_p1 = scmp.lt.s32.totalorder %s696_s16, 2 }
  0x15   : > { %p787_p0 = por %p121_p11, %p120_p10  ;;  %s698_s27 = smov [#allocation2]  }
  0x16   : > { %s928_s25 = scalar_select %p782_p12, 1, 0 }
  0x17   : > { %s929_s26 = scalar_select %p787_p0, 1, 0 }
  0x18   : > { %s155_s28 = sshll.u32 %s698_s27, 4  ;;  %p794_p2 = pnand %p455_p1, %p764_p4  ;;  %s156_s28 = int_to_ptr.vmem [resolvable:$true] %s155_s28 }
  0x19   : > { %s535_s4 = scalar_lea.hbm %s921_s0, 64 }
  0x1a   : > { %p536_p7 = scmp.ne.s32.totalorder %s921_s0, %s535_s4  ;;  %p537_p8 = pneg %p794_p2 }
  0x1b   : > { %p542_p10 = scmp.lt.s32.totalorder %s535_s4, %s535_s4 }
  0x1c   : > { %p538_p4 = pnand %p537_p8, %p536_p7 }
  0x1e   : > { %p539_p9 = pneg %p538_p4 }
  0x20   : > { %p544_p11 = pnand %p542_p10, %p539_p9 }
  0x22   : > { %547 = shalt.err (!%p544_p11)
}
  0x23   : > { %s548_s7 = scalar_lea.vmem %s156_s28, 64  ;;  %s555_s8 = scalar_lea.vmem %s156_s28, 128 }
  0x24   : > { %p549_p1 = scmp.ne.s32.totalorder %s156_s28, %s548_s7  ;;  %p556_p5 = scmp.lt.s32.totalorder %s156_s28, %s156_s28 }
  0x25   : > { %p557_p0 = scmp.lt.s32.totalorder %s555_s8, %s548_s7 }
  0x26   : > { %p551_p13 = pnand %p549_p1, %p537_p8 }
  0x27   : > { %p558_p12 = por %p557_p0, %p556_p5 }
  0x28   : > { %p552_p3 = pneg %p551_p13 }
  0x2a   : > { %p559_p6 = pnand %p558_p12, %p552_p3 }
  0x2c   : > { %562 = shalt.err (!%p559_p6)
}
  0x2d   : > { %447 = dma.hbm_to_vmem [thread:$0]  (!%p794_p2), %s921_s0, 64, %s156_s28, [#allocation3]  }
  0x2e   : > { %p931_p7 = scmp.lt.s32.totalorder %s696_s16, 3  ;;  %p932_p4 = scmp.ge.s32.totalorder %s696_s16, 1 }
  0x2f   : > { %s699_s20 = smov [#allocation5]   ;;  %s563_s30 = scalar_lea.hbm %s922_s1, 64 }
  0x30   : > { %p823_p9 = pnand %p932_p4, %p931_p7  ;;  %s176_s22 = sshll.u32 %s699_s20, 4  ;;  %s177_s22 = int_to_ptr.vmem [resolvable:$true] %s176_s22 }
  0x31   : > { %p564_p6 = scmp.ne.s32.totalorder %s922_s1, %s563_s30  ;;  %p570_p0 = scmp.lt.s32.totalorder %s563_s30, %s563_s30 }
  0x32   : > { %s933_s18 = scalar_select %p823_p9, 1, 0 }
  0x33   : > { %p566_p12 = pnand %p564_p6, %p537_p8 }
  0x35   : > { %p567_p13 = pneg %p566_p12 }
  0x37   : > { %p572_p3 = pnand %p570_p0, %p567_p13 }
  0x39   : > { %575 = shalt.err (!%p572_p3)
}
  0x3a   : > { %s576_s28 = scalar_lea.vmem %s177_s22, 64  ;;  %s583_s5 = scalar_lea.vmem %s177_s22, 128 }
  0x3b   : > { %p577_p5 = scmp.ne.s32.totalorder %s177_s22, %s576_s28  ;;  %p584_p1 = scmp.lt.s32.totalorder %s177_s22, %s177_s22 }
  0x3c   : > { %p585_p7 = scmp.lt.s32.totalorder %s583_s5, %s576_s28 }
  0x3d   : > { %p579_p10 = pnand %p577_p5, %p537_p8 }
  0x3e   : > { %p586_p4 = por %p585_p7, %p584_p1 }
  0x3f   : > { %p580_p11 = pneg %p579_p10 }
  0x41   : > { %p587_p9 = pnand %p586_p4, %p580_p11 }
  0x43   : > { %590 = shalt.err (!%p587_p9)
}
  0x44   : > { %450 = dma.hbm_to_vmem [thread:$0]  (!%p794_p2), %s922_s1, 64, %s177_s22, [#allocation6]  }
  0x45   : > { %p934_p6 = scmp.ne.s32.totalorder %s933_s18, 0 }
  0x46   : > { %s187_s8 = sand.u32 (!%p934_p6), 1, %s684_s13   ;;  %p935_p8 = scmp.ne.s32.totalorder (!%p934_p6), %s927_s21, 0 }
  0x47   : > { %185 = sbr.rel (%p934_p6) target bundleno = 169 (0xa9), region = 28  ;;  %s428_s12 = sshll.u32 (!%p934_p6), %s187_s8, 2 }
  0x48   : > { %s188_s17 = scalar_lea.sflag (!%p934_p6), [#allocation3], %s187_s8  ;;  %s191_s20 = scalar_lea.vmem (!%p934_p6), [#allocation2], %s428_s12 }
  0x4c   : > { %654 = dma.done.wait (%p935_p8), %s188_s17, 64  }
  0x4d   : > { %656 = vsyncadd (%p935_p8), %s188_s17, 4294967232  ;;  %s197_s29 = scalar_lea.sflag [#allocation6], %s187_s8  ;;  %s200_s23 = scalar_lea.vmem [#allocation5], %s428_s12 }
  0x4e   : > { %658 = dma.done.wait (%p935_p8), %s197_s29, 64  }
  0x4f   : > { %660 = vsyncadd (%p935_p8), %s197_s29, 4294967232  ;;  %s223_s18 = sand.u32 1, %s672_s10   ;;  %v700_v0 = vmov 0.0   ;;  %p431_p2 = scmp.ge.s32.totalorder %s688_s14, 1 }
  0x50   : > { %s430_s22 = sshll.u32 %s223_s18, 2 }
  0x51   : > { %s858_s27 = scalar_lea.vmem [#allocation7], %s430_s22  ;;  %241 = sbr.rel (%p431_p2) target bundleno = 145 (0x91), region = 44 }
  0x52   : > { %236 = vst [vmem:[%s858_s27] sm:$0xf] %v700_v0 }
  0x56   : > { %v242_v1 = vld [vmem:[%s191_s20] sm:$0xf]  ;;  %v243_v2 = vld [vmem:[%s200_s23] sm:$0xf]  ;;  %vm262_vm0 = vcmask 1043456   ;;  %v701_v4 = vmov 0.0  }
  0x57   : > { %vm244_vm1 = vcmp.eq.f32.partialorder %v243_v2, 1.0  ;;  %v253_v3 = vand.u32 2147483647, %v242_v1  ;;  %vm247_vm2 = vcmp.eq.f32.partialorder %v243_v2, 0.0  ;;  %v250_v30 = vmax.f32 %v242_v1, 0.0 }
  0x58   : > { %v432_v5 = vsel %vm244_vm1, 1.0, %v701_v4  ;;  %v433_v6 = vsel %vm247_vm2, 1.0, %v701_v4 }
  0x59   : > { %v254_v7 = vsub.f32 0.0, %v253_v3  ;;  %v263_v8 = vsel %vm262_vm0, %v432_v5, 0.0  ;;  %v273_v9 = vsel %vm262_vm0, %v433_v6, 0.0  ;;  %v261_v21 = vld [vmem:[%s858_s27] sm:$0x1]  ;;  %v251_v29 = vmul.f32 %v432_v5, %v242_v1 }
  0x5a   : > { %v264_v10 = vrot.slane %v263_v8, 4  ;;  %v274_v11 = vrot.slane %v273_v9, 4  ;;  %v272_v22 = vld [vmem:[%s858_s27 + $0x1] sm:$0x1]  ;;  %v282_v49 = vld [vmem:[%s858_s27 + $0x2] sm:$0x1] }
  0x5b   : > { %v255_v12 = vmul.f32 1.442695, %v254_v7  ;;  %v252_v31 = vsub.f32 %v250_v30, %v251_v29  ;;  %v293_v50 = vld [vmem:[%s858_s27 + $0x3] sm:$0x1] }
  0x5c   : > { %v265_v13 = vadd.f32 %v264_v10, %v263_v8  ;;  %v275_v14 = vadd.f32 %v274_v11, %v273_v9 }
  0x5d   : > { %531 = vpow2.f32 %v255_v12 }
  0x5e   : > { %v266_v15 = vrot.slane %v265_v13, 2  ;;  %v276_v16 = vrot.slane %v275_v14, 2 }
  0x60   : > { %v267_v17 = vadd.f32 %v266_v15, %v265_v13  ;;  %v277_v18 = vadd.f32 %v276_v16, %v275_v14 }
  0x62   : > { %v268_v19 = vrot.slane %v267_v17, 1  ;;  %v278_v20 = vrot.slane %v277_v18, 1 }
  0x64   : > { %v269_v23 = vadd.f32 %v268_v19, %v267_v17  ;;  %v279_v24 = vadd.f32 %v278_v20, %v277_v18 }
  0x66   : > { %v270_v25 = vadd.f32 %v269_v23, %v261_v21  ;;  %v280_v26 = vadd.f32 %v279_v24, %v272_v22 }
  0x68   : > { %271 = vst [vmem:[%s858_s27] sm:$0x1] %v270_v25  ;;  %281 = vst [vmem:[%s858_s27 + $0x1] sm:$0x1] %v280_v26 }
  0x6a   : > { %v532_v27 = vpop.eup %531 }
  0x6b   : > { %v257_v28 = vadd.f32 1.0, %v532_v27 }
  0x6d   : > { %533 = vlog2.f32 %v257_v28 }
  0x7a   : > { %v534_v32 = vpop.eup %533 }
  0x7b   : > { %v259_v33 = vmul.f32 0.6931472, %v534_v32 }
  0x7d   : > { %v260_v34 = vadd.f32 %v259_v33, %v252_v31 }
  0x7f   : > { %v283_v35 = vmul.f32 %v432_v5, %v260_v34  ;;  %v294_v36 = vmul.f32 %v433_v6, %v260_v34 }
  0x81   : > { %v284_v37 = vsel %vm262_vm0, %v283_v35, 0.0  ;;  %v295_v38 = vsel %vm262_vm0, %v294_v36, 0.0 }
  0x82   : > { %v285_v39 = vrot.slane %v284_v37, 4  ;;  %v296_v40 = vrot.slane %v295_v38, 4 }
  0x84   : > { %v286_v41 = vadd.f32 %v285_v39, %v284_v37  ;;  %v297_v42 = vadd.f32 %v296_v40, %v295_v38 }
  0x86   : > { %v287_v43 = vrot.slane %v286_v41, 2  ;;  %v298_v44 = vrot.slane %v297_v42, 2 }
  0x88   : > { %v288_v45 = vadd.f32 %v287_v43, %v286_v41  ;;  %v299_v46 = vadd.f32 %v298_v44, %v297_v42 }
  0x8a   : > { %v289_v47 = vrot.slane %v288_v45, 1  ;;  %v300_v48 = vrot.slane %v299_v46, 1 }
  0x8c   : > { %v290_v51 = vadd.f32 %v289_v47, %v288_v45  ;;  %v301_v52 = vadd.f32 %v300_v48, %v299_v46 }
  0x8e   : > { %v291_v53 = vadd.f32 %v290_v51, %v282_v49  ;;  %v302_v54 = vadd.f32 %v301_v52, %v293_v50 }
  0x90   : > { %292 = vst [vmem:[%s858_s27 + $0x2] sm:$0x1] %v291_v53  ;;  %303 = vst [vmem:[%s858_s27 + $0x3] sm:$0x1] %v302_v54 }
  0x91 PF: > { %s435_s21 = sshll.u32 %s688_s14, 6  ;;  %s318_s28 = sshll.u32 %s858_s27, 4  ;;  %s319_s28 = int_to_ptr.vmem [resolvable:$true] %s318_s28 }
  0x92   : > { %s316_s4 = scalar_lea.hbm %s923_s2, %s435_s21  ;;  %s305_s5 = scalar_lea.sflag [#allocation4], %s223_s18 }
  0x93   : > { %s591_s6 = scalar_lea.vmem %s319_s28, 64  ;;  %p936_p12 = scmp.ne.s32.totalorder %s928_s25, 0 }
  0x94   : > { %p592_p9 = scmp.ne.s32.totalorder %s319_s28, %s591_s6  ;;  %s702_s7 = smov [#allocation7]  }
  0x95   : > { %s595_s8 = sshll.u32 %s702_s7, 4  ;;  %s596_s8 = int_to_ptr.vmem [resolvable:$false] %s595_s8 }
  0x96   : > { %p593_p13 = pnand %p592_p9, %p936_p12  ;;  %s597_s12 = scalar_lea.vmem %s596_s8, 128 }
  0x97   : > { %p598_p3 = scmp.lt.s32.totalorder %s319_s28, %s596_s8  ;;  %p599_p5 = scmp.lt.s32.totalorder %s597_s12, %s591_s6 }
  0x98   : > { %p594_p0 = pneg %p593_p13 }
  0x99   : > { %p600_p10 = por %p599_p5, %p598_p3 }
  0x9b   : > { %p601_p11 = pnand %p600_p10, %p594_p0 }
  0x9d   : > { %604 = shalt.err (!%p601_p11)
}
  0x9e   : > { %s605_s14 = scalar_lea.hbm %s316_s4, 64  ;;  %s609_s29 = scalar_lea.hbm %s923_s2, 128 }
  0x9f   : > { %p606_p1 = scmp.ne.s32.totalorder %s316_s4, %s605_s14  ;;  %p610_p6 = scmp.lt.s32.totalorder %s316_s4, %s923_s2 }
  0xa0   : > { %p611_p8 = scmp.lt.s32.totalorder %s609_s29, %s605_s14 }
  0xa1   : > { %p607_p7 = pnand %p606_p1, %p936_p12 }
  0xa2   : > { %p612_p2 = por %p611_p8, %p610_p6 }
  0xa3   : > { %p608_p4 = pneg %p607_p7 }
  0xa5   : > { %p613_p9 = pnand %p612_p2, %p608_p4 }
  0xa7   : > { %616 = shalt.err (!%p613_p9)
}
  0xa8   : > { %442 = dma.vmem_to_hbm [thread:$0]  (%p936_p12), %s319_s28, 64, %s316_s4, %s305_s5  }
  0xa9 PF: > { %s330_s22 = sand.u32 1, %s668_s9   ;;  %p937_p13 = scmp.ne.s32.totalorder %s929_s26, 0 }
  0xaa   : > { %p938_p0 = scmp.ge.s32.totalorder %s696_s16, 2  ;;  %s331_s27 = scalar_lea.sflag [#allocation4], %s330_s22 }
  0xac   : > { %p452_p3 = pnand %p938_p0, %p937_p13 }
  0xae   : > { %p453_p5 = pneg %p452_p3 }
  0xb0   : > { %662 = dma.done.wait (%p453_p5), %s331_s27, 64  }
  0xb1   : > { %664 = vsyncadd (%p453_p5), %s331_s27, 4294967232  ;;  %s21_s16 = sadd.s32 1, %s696_s16   ;;  %s939_s9 = smov %s672_s10 }
  0xb2   : > { %p18_p10 = scmp.ge.s32.totalorder %s21_s16, 4   ;;  %s940_s10 = smov %s676_s11 }
  0xb3   : > { %s941_s11 = smov %s776_s24  ;;  %s942_s12 = smov %s684_s13 }
  0xb4   : > { %s911_s13 = smov 0   ;;  %s943_s14 = smov %s692_s15 }
  0xb5   : > { %s944_s15 = smov %s946_s19  ;;  %20 = sbr.rel (!%p18_p10) target bundleno = 9 (0x9), region = 94 }
  0xba   :  { %336 = vsyncpa [#allocation3], 1 }
  0xbb   :  { %338 = vsyncpa [#allocation3 + $0x1], 1 }
  0xbc   :  { %339 = vsyncpa [#allocation6], 1 }
  0xbd   :  { %341 = vsyncpa [#allocation6 + $0x1], 1 }
  0xbe   :  { %342 = vsyncpa [#allocation4], 1 }
  0xbf   :  { %344 = vsyncpa [#allocation4 + $0x1], 1 }

</bundles_post_ra>
